<compile_context>
chip_gen: v5e
topology: v5e:2x2
jax: 0.10.0
libtpu: 0.0.40
codegen_flags: <defaults>
</compile_context>

<pallas_src>
import functools

import jax
import jax.numpy as jnp
from jax.experimental import pallas as pl
from jax.experimental.pallas import tpu as pltpu

C_IN = 3
K = 3  # kernel size

_VMEM_LIMIT_BYTES = 32 * 1024 * 1024    # explicit scoped-VMEM limit (safe on v5e/v6e/v7x)
_VMEM_BLOCK_BUDGET = 12 * 1024 * 1024   # per-grid-step budget incl. double buffers + temps
_TARGET_IN_BYTES = 2 * 1024 * 1024      # ~2 MB of input moved per grid step


def _vmem_per_image(C, HW_pad):
    # Double-buffered input (C planes) + output plane, plus ~(C+3) f32 kernel
    # temporaries (channel planes, acc, mix/rolled tap) per image.
    return (2 * (C + 1) + (C + 3)) * HW_pad * 4


def _choose_batch_tile(N_pad, C, HW_pad):
    """Per-step batch tile: largest multiple-of-8 divisor of N_pad that fits the
    DMA/VMEM budget and still leaves >=2 grid steps (both v7x TCs); otherwise the
    whole (small) batch in one step (block second-minor == full dim stays legal)."""
    per_img = _vmem_per_image(C, HW_pad)
    cap = min(_TARGET_IN_BYTES // (C * HW_pad * 4), _VMEM_BLOCK_BUDGET // per_img)
    best = 0
    d = 8
    limit = min(cap, N_pad // 2)
    while d <= limit:
        if N_pad % d == 0:
            best = d
        d += 8
    return best if best else N_pad


def _conv_sigmoid_kernel(x_ref, w_ref, b_ref, o_ref, *, H, W, HW_pad, C):
    # x_ref: (nb, C*HW_pad) VMEM -- per-image channel planes, lane-dense, 128-aligned
    # w_ref: (C*K*K,)       SMEM -- conv weights (single output channel), OIHW-flat
    # b_ref: (1,)           SMEM -- bias
    # o_ref: (nb, HW_pad)   VMEM -- output (lane-dense)
    HW = H * W
    nb = o_ref.shape[0]

    # Load each channel plane once (128-aligned lane-offset views: free).
    planes = [x_ref[:, c * HW_pad:(c + 1) * HW_pad].astype(jnp.float32)
              for c in range(C)]

    # Boundary-validity masks (padding=1 == zeros outside the image), built ONCE
    # at (1, HW_pad) and broadcast over sublanes in the per-tap select.  Rolled
    # taps that would wrap the flat index, cross an image row, or land in the
    # HW..HW_pad lane-pad region are exactly the positions these masks zero.
    idx = jax.lax.broadcasted_iota(jnp.int32, (1, HW_pad), 1)
    if (W & (W - 1)) == 0:
        x_id = idx & (W - 1)          # W power of two -> cheap modulo
    else:
        x_id = idx % W
    ok_up = idx >= W                  # y - 1 >= 0
    ok_dn = idx < HW - W              # y + 1 <= H - 1
    ok_lt = x_id >= 1                 # x - 1 >= 0
    ok_rt = x_id <= W - 2             # x + 1 <= W - 1
    ok_y = {-1: ok_up, 1: ok_dn}
    ok_x = {-1: ok_lt, 1: ok_rt}

    # Pre-combine per-tap masks (4 corner ANDs happen once, on (1, HW_pad)).
    tap_mask = {}
    for dy in (-1, 0, 1):
        for dx in (-1, 0, 1):
            m = ok_y.get(dy)
            mx = ok_x.get(dx)
            if m is None:
                m = mx
            elif mx is not None:
                m = jnp.logical_and(m, mx)
            tap_mask[(dy, dx)] = m     # None for the center tap

    acc = jnp.full((nb, HW_pad), b_ref[0], dtype=jnp.float32)
    for dy in (-1, 0, 1):
        for dx in (-1, 0, 1):
            # Mix input channels first (VPU MACs), then a single lane roll (XLU,
            # co-issues with the VPU) of the mixed plane instead of per-channel rolls.
            mix = None
            for c in range(C):
                w = w_ref[c * (K * K) + (dy + 1) * K + (dx + 1)]
                term = w * planes[c]
                mix = term if mix is None else mix + term
            shift = dy * W + dx
            if shift != 0:
                # out[i] <- mix[(i + shift) mod HW_pad]  (wrap is masked below)
                mix = pltpu.roll(mix, (-shift) % HW_pad, axis=1)
            m = tap_mask[(dy, dx)]
            if m is not None:
                mix = jnp.where(m, mix, 0.0)   # (1, HW_pad) mask bcast over sublanes
            acc = acc + mix

    # Sigmoid epilogue: exp lands on the EUP slot, off the VPU critical path.
    o_ref[:, :] = jax.nn.sigmoid(acc).astype(o_ref.dtype)


def conv3x3_sigmoid(x, weight, bias):
    """x: (N, 3, H, W) float32 NCHW; weight: (1, 3, 3, 3); bias: (1,) -> (N, 1, H, W)."""
    N, C, H, W = x.shape
    assert C == C_IN
    HW = H * W
    HW_pad = ((HW + 127) // 128) * 128     # lane-dense, 128-aligned plane stride

    xr = x.reshape(N, C, HW)               # free reshape (contiguous NCHW)
    if HW_pad != HW:
        # Keep channel-plane slices 128-lane aligned and output stores unmasked
        # for arbitrary H*W; masks already exclude the pad region.
        xr = jnp.pad(xr, ((0, 0), (0, 0), (0, HW_pad - HW)))

    # Multi-step tiling wanted when the batch is big enough to matter, or needed
    # when a single whole-batch block would blow the per-step VMEM budget.
    need_tiling = (N >= 16) or (_vmem_per_image(C, HW_pad) * N > _VMEM_BLOCK_BUDGET)
    N_pad = N
    if need_tiling and N % 8 != 0:
        # Pad batch to a multiple of 8 so grid tiles stay (8,128)-aligned / full-sublane.
        N_pad = ((N + 7) // 8) * 8
        xr = jnp.pad(xr, ((0, N_pad - N), (0, 0), (0, 0)))

    xf = xr.reshape(N_pad, C * HW_pad)
    w_flat = weight.reshape(-1).astype(jnp.float32)   # (27,)
    b_flat = bias.reshape(-1).astype(jnp.float32)     # (1,)

    nb = _choose_batch_tile(N_pad, C, HW_pad)
    grid = (N_pad // nb,)

    kernel = functools.partial(_conv_sigmoid_kernel, H=H, W=W, HW_pad=HW_pad, C=C)
    out = pl.pallas_call(
        kernel,
        out_shape=jax.ShapeDtypeStruct((N_pad, HW_pad), x.dtype),
        grid=grid,
        in_specs=[
            pl.BlockSpec((nb, C * HW_pad), lambda n: (n, 0)),
            pl.BlockSpec(memory_space=pltpu.MemorySpace.SMEM),
            pl.BlockSpec(memory_space=pltpu.MemorySpace.SMEM),
        ],
        out_specs=pl.BlockSpec((nb, HW_pad), lambda n: (n, 0)),
        compiler_params=pltpu.CompilerParams(
            dimension_semantics=("parallel",),
            vmem_limit_bytes=_VMEM_LIMIT_BYTES,
        ),
    )(xf, w_flat, b_flat)

    out = out[:N, :HW]                     # drop batch/lane padding (no-op if none)
    return out.reshape(N, 1, H, W)


def _reference(x, weight, bias):
    y = jax.lax.conv_general_dilated(
        x, weight, window_strides=(1, 1), padding=((1, 1), (1, 1)),
        dimension_numbers=("NCHW", "OIHW", "NCHW"))
    return jax.nn.sigmoid(y + bias.reshape(1, -1, 1, 1))


if __name__ == "__main__":
    key = jax.random.PRNGKey(0)
    kx, kw, kb = jax.random.split(key, 3)

    N, H, W = 2, 16, 16
    x = jax.random.normal(kx, (N, C_IN, H, W), dtype=jnp.float32)

    # Deterministic parameter init (PyTorch-style uniform bound = 1/sqrt(fan_in)).
    fan_in = C_IN * K * K
    bound = 1.0 / (fan_in ** 0.5)
    weight = jax.random.uniform(kw, (1, C_IN, K, K), minval=-bound, maxval=bound,
                                dtype=jnp.float32)
    bias = jax.random.uniform(kb, (1,), minval=-bound, maxval=bound,
                              dtype=jnp.float32)

    out = conv3x3_sigmoid(x, weight, bias)
    out = jax.block_until_ready(out)

    ref = _reference(x, weight, bias)
    assert out.shape == (N, 1, H, W)
    assert jnp.allclose(out, ref, atol=1e-5, rtol=1e-5)

    print("KERNEL_OK")
</pallas_src>

<mosaic_0001>
module attributes {stable_mosaic.version = 11 : i64} {
  func.func @_conv_sigmoid_kernel(%arg0: i32, %arg1: memref<2x768xf32, #tpu.memory_space<vmem>>, %arg2: memref<27xf32, #tpu.memory_space<smem>>, %arg3: memref<1xf32, #tpu.memory_space<smem>>, %arg4: memref<2x256xf32, #tpu.memory_space<vmem>>) attributes {dimension_semantics = [#tpu.dimension_semantics<parallel>], iteration_bounds = array<i64: 1>, scalar_prefetch = 0 : i64, scratch_operands = 0 : i64, tpu.core_type = #tpu.core_type<tc>, window_params = [{transform_indices = @transform_0, window_bounds = array<i64: 2, 768>}, {transform_indices = @transform_1, window_bounds = array<i64: 27>}, {transform_indices = @transform_2, window_bounds = array<i64: 1>}, {transform_indices = @transform_3, window_bounds = array<i64: 2, 256>}]} {
    %c0 = arith.constant 0 : index
    %c0_0 = arith.constant 0 : index
    %0 = vector.load %arg1[%c0, %c0_0] : memref<2x768xf32, #tpu.memory_space<vmem>>, vector<2x256xf32>
    %c0_1 = arith.constant 0 : index
    %c256 = arith.constant 256 : index
    %1 = vector.load %arg1[%c0_1, %c256] : memref<2x768xf32, #tpu.memory_space<vmem>>, vector<2x256xf32>
    %c0_2 = arith.constant 0 : index
    %c512 = arith.constant 512 : index
    %2 = vector.load %arg1[%c0_2, %c512] : memref<2x768xf32, #tpu.memory_space<vmem>>, vector<2x256xf32>
    %3 = tpu.iota {dimensions = array<i32: 1>} : vector<1x256xi32>
    %c15_i32 = arith.constant 15 : i32
    %4 = vector.broadcast %c15_i32 : i32 to vector<1x256xi32>
    %5 = arith.andi %3, %4 : vector<1x256xi32>
    %c16_i32 = arith.constant 16 : i32
    %6 = vector.broadcast %c16_i32 : i32 to vector<1x256xi32>
    %7 = arith.cmpi sge, %3, %6 : vector<1x256xi32>
    %c240_i32 = arith.constant 240 : i32
    %8 = vector.broadcast %c240_i32 : i32 to vector<1x256xi32>
    %9 = arith.cmpi slt, %3, %8 : vector<1x256xi32>
    %c1_i32 = arith.constant 1 : i32
    %10 = vector.broadcast %c1_i32 : i32 to vector<1x256xi32>
    %11 = arith.cmpi sge, %5, %10 : vector<1x256xi32>
    %c14_i32 = arith.constant 14 : i32
    %12 = vector.broadcast %c14_i32 : i32 to vector<1x256xi32>
    %13 = arith.cmpi sle, %5, %12 : vector<1x256xi32>
    %14 = arith.andi %7, %11 : vector<1x256xi1>
    %15 = arith.andi %7, %13 : vector<1x256xi1>
    %16 = arith.andi %9, %11 : vector<1x256xi1>
    %17 = arith.andi %9, %13 : vector<1x256xi1>
    %c0_3 = arith.constant 0 : index
    %18 = memref.load %arg3[%c0_3] : memref<1xf32, #tpu.memory_space<smem>>
    %19 = vector.broadcast %18 : f32 to vector<2x256xf32>
    %c0_4 = arith.constant 0 : index
    %20 = memref.load %arg2[%c0_4] : memref<27xf32, #tpu.memory_space<smem>>
    %21 = vector.broadcast %20 : f32 to vector<2x256xf32>
    %22 = arith.mulf %21, %0 : vector<2x256xf32>
    %c9 = arith.constant 9 : index
    %23 = memref.load %arg2[%c9] : memref<27xf32, #tpu.memory_space<smem>>
    %24 = vector.broadcast %23 : f32 to vector<2x256xf32>
    %25 = arith.mulf %24, %1 : vector<2x256xf32>
    %26 = arith.addf %22, %25 : vector<2x256xf32>
    %c18 = arith.constant 18 : index
    %27 = memref.load %arg2[%c18] : memref<27xf32, #tpu.memory_space<smem>>
    %28 = vector.broadcast %27 : f32 to vector<2x256xf32>
    %29 = arith.mulf %28, %2 : vector<2x256xf32>
    %30 = arith.addf %26, %29 : vector<2x256xf32>
    %c17_i32 = arith.constant 17 : i32
    %31 = tpu.dynamic_rotate %30 by %c17_i32 dim 1 : vector<2x256xf32>, i32 -> vector<2x256xf32>
    %cst = arith.constant 0.000000e+00 : f32
    %32 = vector.shape_cast %14 : vector<1x256xi1> to vector<1x256xi1>
    %33 = vector.broadcast %32 : vector<1x256xi1> to vector<2x256xi1>
    %34 = vector.broadcast %cst : f32 to vector<2x256xf32>
    %35 = arith.select %33, %31, %34 : vector<2x256xi1>, vector<2x256xf32>
    %36 = arith.addf %19, %35 : vector<2x256xf32>
    %c1 = arith.constant 1 : index
    %37 = memref.load %arg2[%c1] : memref<27xf32, #tpu.memory_space<smem>>
    %38 = vector.broadcast %37 : f32 to vector<2x256xf32>
    %39 = arith.mulf %38, %0 : vector<2x256xf32>
    %c10 = arith.constant 10 : index
    %40 = memref.load %arg2[%c10] : memref<27xf32, #tpu.memory_space<smem>>
    %41 = vector.broadcast %40 : f32 to vector<2x256xf32>
    %42 = arith.mulf %41, %1 : vector<2x256xf32>
    %43 = arith.addf %39, %42 : vector<2x256xf32>
    %c19 = arith.constant 19 : index
    %44 = memref.load %arg2[%c19] : memref<27xf32, #tpu.memory_space<smem>>
    %45 = vector.broadcast %44 : f32 to vector<2x256xf32>
    %46 = arith.mulf %45, %2 : vector<2x256xf32>
    %47 = arith.addf %43, %46 : vector<2x256xf32>
    %c16_i32_5 = arith.constant 16 : i32
    %48 = tpu.dynamic_rotate %47 by %c16_i32_5 dim 1 : vector<2x256xf32>, i32 -> vector<2x256xf32>
    %cst_6 = arith.constant 0.000000e+00 : f32
    %49 = vector.shape_cast %7 : vector<1x256xi1> to vector<1x256xi1>
    %50 = vector.broadcast %49 : vector<1x256xi1> to vector<2x256xi1>
    %51 = vector.broadcast %cst_6 : f32 to vector<2x256xf32>
    %52 = arith.select %50, %48, %51 : vector<2x256xi1>, vector<2x256xf32>
    %53 = arith.addf %36, %52 : vector<2x256xf32>
    %c2 = arith.constant 2 : index
    %54 = memref.load %arg2[%c2] : memref<27xf32, #tpu.memory_space<smem>>
    %55 = vector.broadcast %54 : f32 to vector<2x256xf32>
    %56 = arith.mulf %55, %0 : vector<2x256xf32>
    %c11 = arith.constant 11 : index
    %57 = memref.load %arg2[%c11] : memref<27xf32, #tpu.memory_space<smem>>
    %58 = vector.broadcast %57 : f32 to vector<2x256xf32>
    %59 = arith.mulf %58, %1 : vector<2x256xf32>
    %60 = arith.addf %56, %59 : vector<2x256xf32>
    %c20 = arith.constant 20 : index
    %61 = memref.load %arg2[%c20] : memref<27xf32, #tpu.memory_space<smem>>
    %62 = vector.broadcast %61 : f32 to vector<2x256xf32>
    %63 = arith.mulf %62, %2 : vector<2x256xf32>
    %64 = arith.addf %60, %63 : vector<2x256xf32>
    %c15_i32_7 = arith.constant 15 : i32
    %65 = tpu.dynamic_rotate %64 by %c15_i32_7 dim 1 : vector<2x256xf32>, i32 -> vector<2x256xf32>
    %cst_8 = arith.constant 0.000000e+00 : f32
    %66 = vector.shape_cast %15 : vector<1x256xi1> to vector<1x256xi1>
    %67 = vector.broadcast %66 : vector<1x256xi1> to vector<2x256xi1>
    %68 = vector.broadcast %cst_8 : f32 to vector<2x256xf32>
    %69 = arith.select %67, %65, %68 : vector<2x256xi1>, vector<2x256xf32>
    %70 = arith.addf %53, %69 : vector<2x256xf32>
    %c3 = arith.constant 3 : index
    %71 = memref.load %arg2[%c3] : memref<27xf32, #tpu.memory_space<smem>>
    %72 = vector.broadcast %71 : f32 to vector<2x256xf32>
    %73 = arith.mulf %72, %0 : vector<2x256xf32>
    %c12 = arith.constant 12 : index
    %74 = memref.load %arg2[%c12] : memref<27xf32, #tpu.memory_space<smem>>
    %75 = vector.broadcast %74 : f32 to vector<2x256xf32>
    %76 = arith.mulf %75, %1 : vector<2x256xf32>
    %77 = arith.addf %73, %76 : vector<2x256xf32>
    %c21 = arith.constant 21 : index
    %78 = memref.load %arg2[%c21] : memref<27xf32, #tpu.memory_space<smem>>
    %79 = vector.broadcast %78 : f32 to vector<2x256xf32>
    %80 = arith.mulf %79, %2 : vector<2x256xf32>
    %81 = arith.addf %77, %80 : vector<2x256xf32>
    %c1_i32_9 = arith.constant 1 : i32
    %82 = tpu.dynamic_rotate %81 by %c1_i32_9 dim 1 : vector<2x256xf32>, i32 -> vector<2x256xf32>
    %cst_10 = arith.constant 0.000000e+00 : f32
    %83 = vector.shape_cast %11 : vector<1x256xi1> to vector<1x256xi1>
    %84 = vector.broadcast %83 : vector<1x256xi1> to vector<2x256xi1>
    %85 = vector.broadcast %cst_10 : f32 to vector<2x256xf32>
    %86 = arith.select %84, %82, %85 : vector<2x256xi1>, vector<2x256xf32>
    %87 = arith.addf %70, %86 : vector<2x256xf32>
    %c4 = arith.constant 4 : index
    %88 = memref.load %arg2[%c4] : memref<27xf32, #tpu.memory_space<smem>>
    %89 = vector.broadcast %88 : f32 to vector<2x256xf32>
    %90 = arith.mulf %89, %0 : vector<2x256xf32>
    %c13 = arith.constant 13 : index
    %91 = memref.load %arg2[%c13] : memref<27xf32, #tpu.memory_space<smem>>
    %92 = vector.broadcast %91 : f32 to vector<2x256xf32>
    %93 = arith.mulf %92, %1 : vector<2x256xf32>
    %94 = arith.addf %90, %93 : vector<2x256xf32>
    %c22 = arith.constant 22 : index
    %95 = memref.load %arg2[%c22] : memref<27xf32, #tpu.memory_space<smem>>
    %96 = vector.broadcast %95 : f32 to vector<2x256xf32>
    %97 = arith.mulf %96, %2 : vector<2x256xf32>
    %98 = arith.addf %94, %97 : vector<2x256xf32>
    %99 = arith.addf %87, %98 : vector<2x256xf32>
    %c5 = arith.constant 5 : index
    %100 = memref.load %arg2[%c5] : memref<27xf32, #tpu.memory_space<smem>>
    %101 = vector.broadcast %100 : f32 to vector<2x256xf32>
    %102 = arith.mulf %101, %0 : vector<2x256xf32>
    %c14 = arith.constant 14 : index
    %103 = memref.load %arg2[%c14] : memref<27xf32, #tpu.memory_space<smem>>
    %104 = vector.broadcast %103 : f32 to vector<2x256xf32>
    %105 = arith.mulf %104, %1 : vector<2x256xf32>
    %106 = arith.addf %102, %105 : vector<2x256xf32>
    %c23 = arith.constant 23 : index
    %107 = memref.load %arg2[%c23] : memref<27xf32, #tpu.memory_space<smem>>
    %108 = vector.broadcast %107 : f32 to vector<2x256xf32>
    %109 = arith.mulf %108, %2 : vector<2x256xf32>
    %110 = arith.addf %106, %109 : vector<2x256xf32>
    %c255_i32 = arith.constant 255 : i32
    %111 = tpu.dynamic_rotate %110 by %c255_i32 dim 1 : vector<2x256xf32>, i32 -> vector<2x256xf32>
    %cst_11 = arith.constant 0.000000e+00 : f32
    %112 = vector.shape_cast %13 : vector<1x256xi1> to vector<1x256xi1>
    %113 = vector.broadcast %112 : vector<1x256xi1> to vector<2x256xi1>
    %114 = vector.broadcast %cst_11 : f32 to vector<2x256xf32>
    %115 = arith.select %113, %111, %114 : vector<2x256xi1>, vector<2x256xf32>
    %116 = arith.addf %99, %115 : vector<2x256xf32>
    %c6 = arith.constant 6 : index
    %117 = memref.load %arg2[%c6] : memref<27xf32, #tpu.memory_space<smem>>
    %118 = vector.broadcast %117 : f32 to vector<2x256xf32>
    %119 = arith.mulf %118, %0 : vector<2x256xf32>
    %c15 = arith.constant 15 : index
    %120 = memref.load %arg2[%c15] : memref<27xf32, #tpu.memory_space<smem>>
    %121 = vector.broadcast %120 : f32 to vector<2x256xf32>
    %122 = arith.mulf %121, %1 : vector<2x256xf32>
    %123 = arith.addf %119, %122 : vector<2x256xf32>
    %c24 = arith.constant 24 : index
    %124 = memref.load %arg2[%c24] : memref<27xf32, #tpu.memory_space<smem>>
    %125 = vector.broadcast %124 : f32 to vector<2x256xf32>
    %126 = arith.mulf %125, %2 : vector<2x256xf32>
    %127 = arith.addf %123, %126 : vector<2x256xf32>
    %c241_i32 = arith.constant 241 : i32
    %128 = tpu.dynamic_rotate %127 by %c241_i32 dim 1 : vector<2x256xf32>, i32 -> vector<2x256xf32>
    %cst_12 = arith.constant 0.000000e+00 : f32
    %129 = vector.shape_cast %16 : vector<1x256xi1> to vector<1x256xi1>
    %130 = vector.broadcast %129 : vector<1x256xi1> to vector<2x256xi1>
    %131 = vector.broadcast %cst_12 : f32 to vector<2x256xf32>
    %132 = arith.select %130, %128, %131 : vector<2x256xi1>, vector<2x256xf32>
    %133 = arith.addf %116, %132 : vector<2x256xf32>
    %c7 = arith.constant 7 : index
    %134 = memref.load %arg2[%c7] : memref<27xf32, #tpu.memory_space<smem>>
    %135 = vector.broadcast %134 : f32 to vector<2x256xf32>
    %136 = arith.mulf %135, %0 : vector<2x256xf32>
    %c16 = arith.constant 16 : index
    %137 = memref.load %arg2[%c16] : memref<27xf32, #tpu.memory_space<smem>>
    %138 = vector.broadcast %137 : f32 to vector<2x256xf32>
    %139 = arith.mulf %138, %1 : vector<2x256xf32>
    %140 = arith.addf %136, %139 : vector<2x256xf32>
    %c25 = arith.constant 25 : index
    %141 = memref.load %arg2[%c25] : memref<27xf32, #tpu.memory_space<smem>>
    %142 = vector.broadcast %141 : f32 to vector<2x256xf32>
    %143 = arith.mulf %142, %2 : vector<2x256xf32>
    %144 = arith.addf %140, %143 : vector<2x256xf32>
    %c240_i32_13 = arith.constant 240 : i32
    %145 = tpu.dynamic_rotate %144 by %c240_i32_13 dim 1 : vector<2x256xf32>, i32 -> vector<2x256xf32>
    %cst_14 = arith.constant 0.000000e+00 : f32
    %146 = vector.shape_cast %9 : vector<1x256xi1> to vector<1x256xi1>
    %147 = vector.broadcast %146 : vector<1x256xi1> to vector<2x256xi1>
    %148 = vector.broadcast %cst_14 : f32 to vector<2x256xf32>
    %149 = arith.select %147, %145, %148 : vector<2x256xi1>, vector<2x256xf32>
    %150 = arith.addf %133, %149 : vector<2x256xf32>
    %c8 = arith.constant 8 : index
    %151 = memref.load %arg2[%c8] : memref<27xf32, #tpu.memory_space<smem>>
    %152 = vector.broadcast %151 : f32 to vector<2x256xf32>
    %153 = arith.mulf %152, %0 : vector<2x256xf32>
    %c17 = arith.constant 17 : index
    %154 = memref.load %arg2[%c17] : memref<27xf32, #tpu.memory_space<smem>>
    %155 = vector.broadcast %154 : f32 to vector<2x256xf32>
    %156 = arith.mulf %155, %1 : vector<2x256xf32>
    %157 = arith.addf %153, %156 : vector<2x256xf32>
    %c26 = arith.constant 26 : index
    %158 = memref.load %arg2[%c26] : memref<27xf32, #tpu.memory_space<smem>>
    %159 = vector.broadcast %158 : f32 to vector<2x256xf32>
    %160 = arith.mulf %159, %2 : vector<2x256xf32>
    %161 = arith.addf %157, %160 : vector<2x256xf32>
    %c239_i32 = arith.constant 239 : i32
    %162 = tpu.dynamic_rotate %161 by %c239_i32 dim 1 : vector<2x256xf32>, i32 -> vector<2x256xf32>
    %cst_15 = arith.constant 0.000000e+00 : f32
    %163 = vector.shape_cast %17 : vector<1x256xi1> to vector<1x256xi1>
    %164 = vector.broadcast %163 : vector<1x256xi1> to vector<2x256xi1>
    %165 = vector.broadcast %cst_15 : f32 to vector<2x256xf32>
    %166 = arith.select %164, %162, %165 : vector<2x256xi1>, vector<2x256xf32>
    %167 = arith.addf %150, %166 : vector<2x256xf32>
    %168 = arith.negf %167 : vector<2x256xf32>
    %169 = math.exp %168 : vector<2x256xf32>
    %cst_16 = arith.constant 1.000000e+00 : f32
    %170 = vector.broadcast %cst_16 : f32 to vector<2x256xf32>
    %171 = arith.addf %170, %169 : vector<2x256xf32>
    %172 = arith.divf %170, %171 : vector<2x256xf32>
    %c0_17 = arith.constant 0 : index
    %c0_18 = arith.constant 0 : index
    %173 = vector.load %arg4[%c0_17, %c0_18] : memref<2x256xf32, #tpu.memory_space<vmem>>, vector<2x256xf32>
    tpu.vector_store %arg4[%c0_17, %c0_18], %172 {strides = array<i32>} : memref<2x256xf32, #tpu.memory_space<vmem>>, vector<2x256xf32>,
    return
  }
  func.func @transform_0(%arg0: i32) -> (i32, i32) {
    %c0_i32 = arith.constant 0 : i32
    %c0_i32_0 = arith.constant 0 : i32
    return %arg0, %c0_i32 : i32, i32
  }
  func.func @transform_1(%arg0: i32) -> i32 {
    %c0_i32 = arith.constant 0 : i32
    %c0_i32_0 = arith.constant 0 : i32
    return %c0_i32 : i32
  }
  func.func @transform_2(%arg0: i32) -> i32 {
    %c0_i32 = arith.constant 0 : i32
    %c0_i32_0 = arith.constant 0 : i32
    return %c0_i32 : i32
  }
  func.func @transform_3(%arg0: i32) -> (i32, i32) {
    %c0_i32 = arith.constant 0 : i32
    %c0_i32_0 = arith.constant 0 : i32
    return %arg0, %c0_i32 : i32, i32
  }
}

</mosaic_0001>

<bundles_post_ra>
// kernel: tpu_custom_call.1
= control target key start
LH: loop header
LB: loop body
LE: loop exit
PB: predicated region body
PF: predicated region fallthrough
CT: control target
= control target key end

     0   :  { %9 = vsyncpa [#allocation4], 0  ;;  %s686_s0 = inlined_call_operand.hbm [shape: f32[2,768], index: 0, kind: input, shape index: {}]   ;;  %s687_s1 = inlined_call_operand.vmem [shape: f32[27], index: 1, kind: input, shape index: {}]   ;;  %s688_s2 = inlined_call_operand.<no memory space> [shape: f32[1], index: 2, kind: input, shape index: {}]   ;;  %s689_s3 = inlined_call_operand.hbm [shape: f32[2,256], index: 3, kind: output, shape index: {}]  }
   0x1   :  { %10 = vsyncpa [#allocation6], 0 }
   0x2   :  { %11 = vsyncpa [#allocation5], 0  ;;  %s17_s14 = sshll.u32 %s686_s0, 4  ;;  %s520_s15 = smov [#allocation3]   ;;  %s18_s14 = int_to_ptr.hbm [resolvable:$true] %s17_s14 }
   0x3   :  { %s19_s16 = sshll.u32 %s520_s15, 4  ;;  %s28_s19 = sshll.u32 %s687_s1, 4  ;;  %s20_s16 = int_to_ptr.vmem [resolvable:$true] %s19_s16  ;;  %s29_s19 = int_to_ptr.vmem [resolvable:$true] %s28_s19 }
   0x4   :  { %22 = dma.hbm_to_vmem [thread:$0]  %s18_s14, 192, %s20_s16, [#allocation4]  }
   0x5   :  { %s521_s20 = smov [#allocation7]  }
   0x6   :  { %31 = dma.vmem_to_smem %s29_s19, 16, %s521_s20, [#allocation6]  }
   0x7   :  { %514 = dma.done.wait [#allocation4], 192  }
   0x8   :  { %515 = vsyncadd [#allocation4], 4294967104 }
   0x9   :  { %516 = dma.done.wait [#allocation6], 16  }
   0xa   :  { %517 = vsyncadd [#allocation6], 4294967280 }
   0xb   :  { %42 = sfence }
   0xc   :  { %s69_s21 = sld [smem:[#allocation7]]  ;;  %v557_v0 = vld [vmem:[#allocation3] sm:$0xf]  ;;  %v559_v1 = vld [vmem:[#allocation3 + $0x4] sm:$0xf]  ;;  %s522_s4 = smov 17  }
   0xd   :  { %s407_s22 = sld [smem:[#allocation7 + $0x9]]  ;;  %v561_v2 = vld [vmem:[#allocation3 + $0x8] sm:$0xf]  ;;  %s523_s11 = smov 16  }
   0xe   :  { %s408_s0 = sld [smem:[#allocation7 + $0x12]]  ;;  %s524_s16 = smov 15  }
   0xf   :  { %s409_s23 = sld [smem:[#allocation7 + $0x1]]  ;;  %s525_s20 = smov 1  }
  0x10   :  { %s410_s24 = sld [smem:[#allocation7 + $0xa]] }
  0x11   :  { %s411_s25 = sld [smem:[#allocation7 + $0x13]] }
  0x12   :  { %v70_v3 = vstv %s69_s21  ;;  %s430_s1 = sld [smem:[#allocation7 + $0x8]] }
  0x13   :  { %v71_v4 = vmul.f32 %v70_v3, %v557_v0  ;;  %v73_v5 = vstv %s407_s22  ;;  %s431_s26 = sld [smem:[#allocation7 + $0x11]] }
  0x14   :  { %v74_v6 = vmul.f32 %v73_v5, %v559_v1  ;;  %v77_v7 = vstv %s408_s0  ;;  %s432_s27 = sld [smem:[#allocation7 + $0x1a]]  ;;  %s526_s0 = smov 127  }
  0x15   :  { %v78_v8 = vmul.f32 %v77_v7, %v561_v2  ;;  %v102_v9 = vstv %s409_s23  ;;  %s412_s28 = sld [smem:[#allocation7 + $0x2]]  ;;  %s527_s23 = smov 113  }
  0x16   :  { %v75_v10 = vadd.f32 %v74_v6, %v71_v4  ;;  %v103_v11 = vmul.f32 %v102_v9, %v557_v0  ;;  %v105_v12 = vstv %s410_s24  ;;  %s413_s29 = sld [smem:[#allocation7 + $0xb]]  ;;  %s528_s24 = smov 112  }
  0x17   :  { %v106_v13 = vmul.f32 %v105_v12, %v559_v1  ;;  %v109_v14 = vstv %s411_s25  ;;  %s414_s30 = sld [smem:[#allocation7 + $0x14]]  ;;  %s529_s25 = smov 111  }
  0x18   :  { %v79_v15 = vadd.f32 %v78_v8, %v75_v10  ;;  %v110_v17 = vmul.f32 %v109_v14, %v561_v2  ;;  %v313_v21 = vstv %s430_s1  ;;  %s415_s5 = sld [smem:[#allocation7 + $0x3]] }
  0x19   :  { %v107_v16 = vadd.f32 %v106_v13, %v103_v11  ;;  %v314_v22 = vmul.f32 %v313_v21, %v557_v0  ;;  %v316_v23 = vstv %s431_s26  ;;  %s416_s6 = sld [smem:[#allocation7 + $0xc]] }
  0x1a   :  { %81 = vst [vmem:[#allocation1] ss:$4 sm:$0xff] %v79_v15  ;;  %v317_v24 = vmul.f32 %v316_v23, %v559_v1  ;;  %v320_v25 = vstv %s432_s27  ;;  %s417_s7 = sld [smem:[#allocation7 + $0x15]] }
  0x1b   :  { %v111_v18 = vadd.f32 %v110_v17, %v107_v16  ;;  %v321_v26 = vmul.f32 %v320_v25, %v561_v2  ;;  %v134_v27 = vstv %s412_s28  ;;  %s418_s8 = sld [smem:[#allocation7 + $0x4]] }
  0x1c   :  { %v318_v28 = vadd.f32 %v317_v24, %v314_v22  ;;  %v135_v29 = vmul.f32 %v134_v27, %v557_v0  ;;  %v137_v30 = vstv %s413_s29  ;;  %s419_s9 = sld [smem:[#allocation7 + $0xd]] }
  0x1d   :  { %v138_v31 = vmul.f32 %v137_v30, %v559_v1  ;;  %v141_v32 = vstv %s414_s30  ;;  %s420_s10 = sld [smem:[#allocation7 + $0x16]]  ;;  %s396_s30 = sshll.u32 %s689_s3, 4  ;;  %s397_s30 = int_to_ptr.hbm [resolvable:$true] %s396_s30 }
  0x1e   :  { %v574_v33 = vadd.f32 %v321_v26, %v318_v28  ;;  %v142_v34 = vmul.f32 %v141_v32, %v561_v2  ;;  %v166_v36 = vstv %s415_s5  ;;  %s421_s12 = sld [smem:[#allocation7 + $0x5]] }
  0x1f   :  { %v139_v35 = vadd.f32 %v138_v31, %v135_v29  ;;  %v167_v39 = vmul.f32 %v166_v36, %v557_v0  ;;  %v169_v40 = vstv %s416_s6  ;;  %s422_s13 = sld [smem:[#allocation7 + $0xe]]  ;;  %v46_v31 = vlaneseq }
  0x20   :  { %v170_v42 = vmul.f32 %v169_v40, %v559_v1  ;;  %v173_v43 = vstv %s417_s7  ;;  %s423_s14 = sld [smem:[#allocation7 + $0x17]] }
  0x21   :  { %v82_v19 = vld.sshfl [vmem:[#allocation1] sm:$0xff pattern:$0x73625140]  ;;  %v83_v20 = vld.sshfl [vmem:[#allocation1 + $0x8] sm:$0xff pattern:$0x73625140]  ;;  %v143_v41 = vadd.f32 %v142_v34, %v139_v35  ;;  %v174_v45 = vmul.f32 %v173_v43, %v561_v2  ;;  %v198_v46 = vstv %s418_s8 }
  0x22   :  { %86 = vrot.lane.b32.xlu0 %v82_v19, %s522_s4  ;;  %113 = vst [vmem:[#allocation1] ss:$4 sm:$0xff] %v111_v18  ;;  %v171_v44 = vadd.f32 %v170_v42, %v167_v39  ;;  %v201_v47 = vstv %s419_s9  ;;  %v199_v49 = vmul.f32 %v198_v46, %v557_v0  ;;  %s424_s15 = sld [smem:[#allocation7 + $0x6]]  ;;  %v597_v32 = vand.u32 127, %v46_v31 }
  0x23   :  { %v202_v50 = vmul.f32 %v201_v47, %v559_v1  ;;  %v205_v51 = vstv %s420_s10  ;;  %s425_s17 = sld [smem:[#allocation7 + $0xf]] }
  0x24   :  { %v175_v48 = vadd.f32 %v174_v45, %v171_v44  ;;  %v206_v55 = vmul.f32 %v205_v51, %v561_v2  ;;  %v217_v56 = vstv %s421_s12  ;;  %s426_s18 = sld [smem:[#allocation7 + $0x18]]  ;;  %v600_v35 = vadd.s32 128, %v597_v32 }
  0x25   :  { %v203_v54 = vadd.f32 %v202_v50, %v199_v49  ;;  %v220_v57 = vstv %s422_s13  ;;  %v218_v58 = vmul.f32 %v217_v56, %v557_v0  ;;  %s427_s19 = sld [smem:[#allocation7 + $0x7]]  ;;  %v49_v36 = vand.u32 15, %v597_v32 }
  0x26   :  { %v221_v59 = vmul.f32 %v220_v57, %v559_v1  ;;  %v224_v61 = vstv %s423_s14  ;;  %s428_s21 = sld [smem:[#allocation7 + $0x10]]  ;;  %vm51_vm0 = vcmp.ge.s32.totalorder %v597_v32, 16  ;;  %vm90_vm2 = vcmp.lt.s32.totalorder %v597_v32, 17 }
  0x27   :  { %v207_v60 = vadd.f32 %v206_v55, %v203_v54  ;;  %v225_v4 = vmul.f32 %v224_v61, %v561_v2  ;;  %s429_s22 = sld [smem:[#allocation7 + $0x19]]  ;;  %vm605_vm1 = vcmp.ge.s32.totalorder %v49_v36, 1  ;;  %vm122_vm5 = vcmp.lt.s32.totalorder %v597_v32, 16 }
  0x28   :  { %v222_v3 = vadd.f32 %v221_v59, %v218_v58  ;;  %v249_v5 = vstv %s424_s15  ;;  %vm59_vm4 = vmand %vm51_vm0, %vm605_vm1  ;;  %v68_v44 = vstv %s688_s2  ;;  %vm624_vm6 = vcmp.le.s32.totalorder %v49_v36, 14  ;;  %s530_s2 = smov [#allocation8]  }
  0x29   :  { %v114_v37 = vld.sshfl [vmem:[#allocation1] sm:$0xff pattern:$0x73625140]  ;;  %v115_v38 = vld.sshfl [vmem:[#allocation1 + $0x8] sm:$0xff pattern:$0x73625140]  ;;  %v252_v6 = vstv %s425_s17  ;;  %v250_v8 = vmul.f32 %v249_v5, %v557_v0  ;;  %vm61_vm9 = vmand %vm51_vm0, %vm624_vm6 }
  0x2a   :  { %118 = vrot.lane.b32.xlu1 %v114_v37, %s523_s11  ;;  %88 = vrot.lane.b32.xlu0 %v83_v20, %s522_s4  ;;  %145 = vst [vmem:[#allocation1] ss:$4 sm:$0xff] %v143_v41  ;;  %v226_v7 = vadd.f32 %v225_v4, %v222_v3  ;;  %v253_v9 = vmul.f32 %v252_v6, %v559_v1  ;;  %v256_v10 = vstv %s426_s18  ;;  %vm154_vm7 = vcmp.lt.s32.totalorder %v597_v32, 15  ;;  %s394_s27 = sshll.u32 %s530_s2, 4  ;;  %s395_s27 = int_to_ptr.vmem [resolvable:$true] %s394_s27 }
  0x2b   :  { %v257_v14 = vmul.f32 %v256_v10, %v561_v2  ;;  %v281_v15 = vstv %s427_s19  ;;  %vm186_vm10 = vcmp.lt.s32.totalorder %v597_v32, 1  ;;  %vm237_vm11 = vcmp.lt.s32.totalorder %v597_v32, 127 }
  0x2c   :  { %v254_v13 = vadd.f32 %v253_v9, %v250_v8  ;;  %v284_v16 = vstv %s428_s21  ;;  %v282_v18 = vmul.f32 %v281_v15, %v557_v0  ;;  %vm54_vm12 = vcmp.lt.s32.totalorder %v600_v35, 240 }
  0x2d   :  { %v285_v19 = vmul.f32 %v284_v16, %v559_v1  ;;  %v288_v20 = vstv %s429_s22  ;;  %vm269_vm13 = vcmp.lt.s32.totalorder %v597_v32, 113  ;;  %vm301_vm14 = vcmp.lt.s32.totalorder %v597_v32, 112 }
  0x2e   :  { %v258_v17 = vadd.f32 %v257_v14, %v254_v13  ;;  %v289_v24 = vmul.f32 %v288_v20, %v561_v2 }
  0x2f   :  { %v286_v23 = vadd.f32 %v285_v19, %v282_v18 }
  0x31   :  { %v146_v52 = vld.sshfl [vmem:[#allocation1] sm:$0xff pattern:$0x73625140]  ;;  %v147_v53 = vld.sshfl [vmem:[#allocation1 + $0x8] sm:$0xff pattern:$0x73625140]  ;;  %v290_v25 = vadd.f32 %v289_v24, %v286_v23 }
  0x32   :  { %120 = vrot.lane.b32.xlu1 %v115_v38, %s523_s11  ;;  %177 = vst [vmem:[#allocation1] ss:$4 sm:$0xff] %v175_v48  ;;  %150 = vrot.lane.b32.xlu2 %v146_v52, %s524_s16 }
  0x39   :  { %v179_v62 = vld.sshfl [vmem:[#allocation1 + $0x8] sm:$0xff pattern:$0x73625140]  ;;  %v178_v63 = vld.sshfl [vmem:[#allocation1] sm:$0xff pattern:$0x73625140] }
  0x3a   :  { %184 = vrot.lane.b32.xlu1 %v179_v62, %s525_s20  ;;  %182 = vrot.lane.b32.xlu0 %v178_v63, %s525_s20  ;;  %209 = vst [vmem:[#allocation1] ss:$4 sm:$0xff] %v207_v60 }
  0x3b   :  { %152 = vrot.lane.b32.xlu2 %v147_v53, %s524_s16 }
  0x41   :  { %v588_v11 = vld.sshfl [vmem:[#allocation1] sm:$0xff pattern:$0x73625140]  ;;  %v590_v12 = vld.sshfl [vmem:[#allocation1 + $0x8] sm:$0xff pattern:$0x73625140] }
  0x42   :  { %228 = vst [vmem:[#allocation1] ss:$4 sm:$0xff] %v226_v7 }
  0x49   :  { %v230_v21 = vld.sshfl [vmem:[#allocation1 + $0x8] sm:$0xff pattern:$0x73625140]  ;;  %v229_v22 = vld.sshfl [vmem:[#allocation1] sm:$0xff pattern:$0x73625140] }
  0x4a   :  { %235 = vrot.lane.b32.xlu0 %v230_v21, %s526_s0  ;;  %260 = vst [vmem:[#allocation1] ss:$4 sm:$0xff] %v258_v17  ;;  %233 = vrot.lane.b32.xlu2 %v229_v22, %s526_s0 }
  0x51   :  { %v261_v26 = vld.sshfl [vmem:[#allocation1] sm:$0xff pattern:$0x73625140]  ;;  %v262_v27 = vld.sshfl [vmem:[#allocation1 + $0x8] sm:$0xff pattern:$0x73625140] }
  0x52   :  { %265 = vrot.lane.b32.xlu1 %v261_v26, %s527_s23  ;;  %292 = vst [vmem:[#allocation1] ss:$4 sm:$0xff] %v290_v25  ;;  %267 = vrot.lane.b32.xlu2 %v262_v27, %s527_s23 }
  0x59   :  { %v294_v0 = vld.sshfl [vmem:[#allocation1 + $0x8] sm:$0xff pattern:$0x73625140]  ;;  %v293_v28 = vld.sshfl [vmem:[#allocation1] sm:$0xff pattern:$0x73625140] }
  0x5a   :  { %299 = vrot.lane.b32.xlu1 %v294_v0, %s528_s24  ;;  %297 = vrot.lane.b32.xlu0 %v293_v28, %s528_s24  ;;  %324 = vst [vmem:[#allocation1] ss:$4 sm:$0xff] %v574_v33  ;;  %v50_v33 = vand.u32 15, %v600_v35 }
  0x5c   :  { %vm610_vm3 = vcmp.ge.s32.totalorder %v50_v33, 1  ;;  %vm631_vm8 = vcmp.le.s32.totalorder %v50_v33, 14 }
  0x5d   :  { %vm654_vm15 = vmand %vm54_vm12, %vm610_vm3 }
  0x61   :  { %v326_v1 = vld.sshfl [vmem:[#allocation1 + $0x8] sm:$0xff pattern:$0x73625140]  ;;  %v325_v2 = vld.sshfl [vmem:[#allocation1] sm:$0xff pattern:$0x73625140] }
  0x62   :  { %331 = vrot.lane.b32.xlu0 %v326_v1, %s529_s25  ;;  %329 = vrot.lane.b32.xlu2 %v325_v2, %s529_s25 }
  0x8c   :  { %v151_v34 = vpop.permute.xlu2 %150 }
  0x94   :  { %v87_v29 = vpop.permute.xlu0 %86 }
  0x95   :  { %v153_v40 = vpop.permute.xlu2 %152 }
  0x96   :  { %v155_v57 = vsel %vm154_vm7, %v151_v34, %v153_v40  ;;  %v156_v58 = vsel %vm154_vm7, %v153_v40, %v151_v34 }
  0x97   :  { %v161_v61 = vsel %vm61_vm9, %v156_v58, 0.0  ;;  %v162_v62 = vsel %vm631_vm8, %v155_v57, 0.0  ;;  %vm385_vm9 = vcmask 1041408  }
  0x9c   :  { %v119_v30 = vpop.permute.xlu1 %118  ;;  %v89_v37 = vpop.permute.xlu0 %88 }
  0x9d   :  { %v91_v42 = vsel %vm90_vm2, %v87_v29, %v89_v37  ;;  %v92_v43 = vsel %vm90_vm2, %v89_v37, %v87_v29  ;;  %vm66_vm2 = vmand %vm54_vm12, %vm631_vm8 }
  0x9e   :  { %v97_v45 = vsel %vm59_vm4, %v92_v43, 0.0  ;;  %v98_v46 = vsel %vm610_vm3, %v91_v42, 0.0 }
  0x9f   :  { %v99_v51 = vadd.f32 %v97_v45, %v68_v44  ;;  %v100_v52 = vadd.f32 %v98_v46, %v68_v44 }
  0xa4   :  { %v121_v38 = vpop.permute.xlu1 %120  ;;  %v234_v55 = vpop.permute.xlu2 %233 }
  0xa5   :  { %v124_v49 = vsel %vm122_vm5, %v121_v38, %v119_v30  ;;  %v123_v53 = vsel %vm122_vm5, %v119_v30, %v121_v38 }
  0xa6   :  { %v129_v54 = vsel %vm51_vm0, %v124_v49, 0.0  ;;  %v132_v60 = vadd.f32 %v123_v53, %v100_v52  ;;  %vm333_vm0 = vcmp.lt.s32.totalorder %v597_v32, 111 }
  0xa7   :  { %v131_v59 = vadd.f32 %v129_v54, %v99_v51 }
  0xa8   :  { %v164_v7 = vadd.f32 %v162_v62, %v132_v60 }
  0xa9   :  { %v163_v6 = vadd.f32 %v161_v61, %v131_v59 }
  0xac   :  { %v185_v47 = vpop.permute.xlu1 %184  ;;  %v183_v48 = vpop.permute.xlu0 %182 }
  0xad   :  { %v187_v4 = vsel %vm186_vm10, %v183_v48, %v185_v47  ;;  %v188_v5 = vsel %vm186_vm10, %v185_v47, %v183_v48  ;;  %v268_v10 = vpop.permute.xlu2 %267 }
  0xae   :  { %v193_v8 = vsel %vm605_vm1, %v188_v5, 0.0  ;;  %v194_v9 = vsel %vm610_vm3, %v187_v4, 0.0 }
  0xaf   :  { %v195_v13 = vadd.f32 %v193_v8, %v163_v6  ;;  %v196_v14 = vadd.f32 %v194_v9, %v164_v7 }
  0xb1   :  { %v215_v24 = vadd.f32 %v590_v12, %v196_v14  ;;  %v214_v25 = vadd.f32 %v588_v11, %v195_v13 }
  0xbc   :  { %v236_v63 = vpop.permute.xlu0 %235  ;;  %v330_v30 = vpop.permute.xlu2 %329 }
  0xbd   :  { %v238_v15 = vsel %vm237_vm11, %v234_v55, %v236_v63  ;;  %v239_v16 = vsel %vm237_vm11, %v236_v63, %v234_v55 }
  0xbe   :  { %v244_v22 = vsel %vm624_vm6, %v238_v15, 0.0  ;;  %v245_v23 = vsel %vm631_vm8, %v239_v16, 0.0 }
  0xbf   :  { %v246_v28 = vadd.f32 %v244_v22, %v214_v25  ;;  %v247_v1 = vadd.f32 %v245_v23, %v215_v24 }
  0xc4   :  { %v266_v3 = vpop.permute.xlu1 %265 }
  0xc5   :  { %v270_v20 = vsel %vm269_vm13, %v266_v3, %v268_v10  ;;  %v271_v21 = vsel %vm269_vm13, %v268_v10, %v266_v3 }
  0xc6   :  { %v276_v27 = vsel %vm605_vm1, %v270_v20, 0.0  ;;  %v277_v0 = vsel %vm654_vm15, %v271_v21, 0.0 }
  0xc7   :  { %v278_v31 = vadd.f32 %v276_v27, %v246_v28  ;;  %v279_v12 = vadd.f32 %v277_v0, %v247_v1 }
  0xcc   :  { %v300_v17 = vpop.permute.xlu1 %299  ;;  %v298_v18 = vpop.permute.xlu0 %297 }
  0xcd   :  { %v303_v26 = vsel %vm301_vm14, %v300_v17, %v298_v18  ;;  %v302_v2 = vsel %vm301_vm14, %v298_v18, %v300_v17 }
  0xce   :  { %v309_v29 = vsel %vm54_vm12, %v303_v26, 0.0  ;;  %v310_v34 = vadd.f32 %v302_v2, %v278_v31 }
  0xcf   :  { %v311_v36 = vadd.f32 %v309_v29, %v279_v12 }
  0xd4   :  { %v332_v11 = vpop.permute.xlu0 %331 }
  0xd5   :  { %v334_v37 = vsel %vm333_vm0, %v330_v30, %v332_v11  ;;  %v335_v38 = vsel %vm333_vm0, %v332_v11, %v330_v30 }
  0xd6   :  { %v340_v33 = vsel %vm624_vm6, %v334_v37, 0.0  ;;  %v341_v39 = vsel %vm66_vm2, %v335_v38, 0.0 }
  0xd7   :  { %v342_v40 = vadd.f32 %v340_v33, %v310_v34  ;;  %v343_v41 = vadd.f32 %v341_v39, %v311_v36 }
  0xd9   :  { %v433_v32 = vmul.f32 -1.442695, %v342_v40  ;;  %v434_v42 = vmul.f32 -1.442695, %v343_v41 }
  0xdb   :  { %446 = vpow2.f32 %v433_v32 }
  0xdc   :  { %448 = vpow2.f32 %v434_v42 }
  0xe1   :  { %v447_v43 = vpop.eup %446 }
  0xe2   :  { %v449_v44 = vpop.eup %448  ;;  %v350_v45 = vadd.f32 1.0, %v447_v43 }
  0xe3   :  { %v351_v35 = vadd.f32 1.0, %v449_v44 }
  0xe4   :  { %450 = vrcp.f32 %v350_v45  ;;  %vm357_vm4 = vweird.f32 %v350_v45  ;;  %v363_v57 = vand.u32 2147483648, %v350_v45  ;;  %v361_v59 = vand.u32 2147483647, %v350_v45 }
  0xe5   :  { %452 = vrcp.f32 %v351_v35  ;;  %v378_v53 = vand.u32 2147483648, %v351_v35  ;;  %v376_v55 = vand.u32 2147483647, %v351_v35  ;;  %vm372_vm6 = vweird.f32 %v351_v35 }
  0xe6   :  { %v364_v3 = vor.u32 1.1754944e-38, %v363_v57  ;;  %vm362_vm10 = vcmp.eq.f32.partialorder %v361_v59, 8.507059e+37 }
  0xe7   :  { %v379_v61 = vor.u32 1.1754944e-38, %v378_v53  ;;  %vm377_vm8 = vcmp.eq.f32.partialorder %v376_v55, 8.507059e+37 }
  0xea   :  { %v451_v46 = vpop.eup %450 }
  0xeb   :  { %v453_v47 = vpop.eup %452  ;;  %v353_v48 = vmul.f32 %v451_v46, %v350_v45  ;;  %vm358_vm1 = vweird.f32 %v451_v46 }
  0xec   :  { %v368_v49 = vmul.f32 %v453_v47, %v351_v35  ;;  %vm373_vm3 = vweird.f32 %v453_v47  ;;  %vm677_vm5 = vmor %vm357_vm4, %vm358_vm1 }
  0xed   :  { %v354_v51 = vsub.f32 1.0, %v353_v48  ;;  %vm374_vm7 = vmor %vm372_vm6, %vm373_vm3 }
  0xee   :  { %v369_v50 = vsub.f32 1.0, %v368_v49 }
  0xef   :  { %v355_v52 = vmul.f32 %v451_v46, %v354_v51 }
  0xf0   :  { %v370_v54 = vmul.f32 %v453_v47, %v369_v50 }
  0xf1   :  { %v356_v56 = vadd.f32 %v451_v46, %v355_v52 }
  0xf2   :  { %v371_v60 = vadd.f32 %v453_v47, %v370_v54 }
  0xf3   :  { %v360_v62 = vsel %vm677_vm5, %v451_v46, %v356_v56 }
  0xf4   :  { %v375_v63 = vsel %vm374_vm7, %v453_v47, %v371_v60  ;;  %v365_v6 = vsel %vm362_vm10, %v364_v3, %v360_v62 }
  0xf5   :  { %v380_v4 = vsel %vm377_vm8, %v379_v61, %v375_v63 }
  0xf6   :  { %v384_v5 = vrot.slane %v380_v4, 6 }
  0xf8   :  { %v386_v7 = vsel %vm385_vm9, %v365_v6, %v384_v5 }
  0xf9   :  { %388 = vst [vmem:[#allocation8] sm:$0xf] %v386_v7 }
  0xfa   :  { %399 = dma.vmem_to_hbm [thread:$0]  %s395_s27, 64, %s397_s30, [#allocation5]  }
  0xfb   :  { %518 = dma.done.wait [#allocation5], 64  }
  0xfc   :  { %519 = vsyncadd [#allocation5], 4294967232 }
  0xfd   :  { %404 = vsyncpa [#allocation4], 1 }
  0xfe   :  { %405 = vsyncpa [#allocation5], 1 }
  0xff   :  { %406 = vsyncpa [#allocation6], 1 }

</bundles_post_ra>
